<compile_context>
chip_gen: v7x
topology: tpu7x:2x2x1
jax: 0.10.0
libtpu: 0.0.40
codegen_flags: <defaults>
</compile_context>

<pallas_src>
import functools

import jax
import jax.numpy as jnp
from jax import lax
from jax.experimental import pallas as pl
from jax.experimental.pallas import tpu as pltpu

IN_F = 3
HIDDEN = 50
OUT_F = 3


def _round_up(x, m):
    return (x + m - 1) // m * m


def _chip_defaults():
    """Return (max lane-tile, vmem_limit_bytes) for the current chip.

    Tile caps keep the (50, TB) f32 intermediates plus the double-buffered
    (3, TB) input/output tiles comfortably inside each generation's VMEM
    budget (v5e 16 MiB scoped default / 128 MiB physical; v6e 32/128;
    v7x 32/64).
    """
    try:
        kind = jax.devices()[0].device_kind.lower().replace(" ", "")
    except Exception:  # pragma: no cover - defensive
        kind = ""
    if "v7" in kind:
        return 16384, 32 << 20          # v7x: only 64 MiB physical VMEM
    if "v6" in kind:
        return 32768, 96 << 20          # v6e: 128 MiB physical VMEM
    if "v5e" in kind or "v5lite" in kind:
        return 8192, 64 << 20           # v5e: raise the 16 MiB scoped default
    return 8192, None                   # v2/v3/v4/v5p/unknown: conservative


def _choose_tiling(batch, cap):
    """Pick (tile_lanes, padded_batch) for a raw batch size we get to pad.

    Guarantees: tile is a multiple of 128 and <= cap, and the grid has >= 2
    tiles whenever the lane-padded batch exceeds one 128-lane row (so the
    "parallel" axis actually feeds both v7x TensorCores).
    """
    b_lane = _round_up(max(batch, 1), 128)
    if b_lane <= 128:
        return 128, 128
    tb = min(cap, _round_up(b_lane // 2, 128))
    b_pad = _round_up(batch, tb)
    return tb, b_pad


def _pick_tile(b_pad, cap):
    """Largest lane-aligned tile <= cap that divides an already-padded batch,
    preferring >= 2 tiles when b_pad > 128 (megacore)."""
    assert b_pad % 128 == 0
    m = b_pad // 128
    want_tiles = 2 if b_pad > 128 else 1
    best = 128
    for d in range(1, m + 1):
        if m % d == 0:
            tb = 128 * d
            if tb <= cap and b_pad // tb >= want_tiles:
                best = max(best, tb)
    return best


# --------------------------------------------------------------------------
# Single forward pass:  o = W2 @ tanh(W1 @ yT + b1) + b2        (batch on lanes)
# --------------------------------------------------------------------------
def _odefunc_kernel(yt_ref, w1_ref, b1_ref, w2_ref, b2_ref, ot_ref, *, act_dtype):
    yt = yt_ref[...]                                                    # (3, TB)
    h = jnp.dot(w1_ref[...], yt, preferred_element_type=jnp.float32)   # (50, TB)
    h = h + b1_ref[...]                                                 # lane bcast
    # bf16 tanh is opt-in; layer 2 and the output always accumulate/store f32.
    h = jnp.tanh(h.astype(act_dtype)).astype(jnp.float32)
    o = jnp.dot(w2_ref[...], h, preferred_element_type=jnp.float32)    # (3, TB)
    o = o + b2_ref[...]
    ot_ref[...] = o.astype(ot_ref.dtype)                               # lane-dense vst


def _run_forward_t(y_t, params, tb, act_dtype, vmem_limit):
    """pallas_call for a (3, b_pad) state; b_pad must be divisible by tb."""
    w1, b1, w2, b2 = params
    _, b_pad = y_t.shape
    grid = (b_pad // tb,)
    return pl.pallas_call(
        functools.partial(_odefunc_kernel, act_dtype=act_dtype),
        out_shape=jax.ShapeDtypeStruct((OUT_F, b_pad), jnp.float32),
        grid_spec=pltpu.PrefetchScalarGridSpec(
            num_scalar_prefetch=0,
            grid=grid,
            in_specs=[
                # Batch-tiled input (double-buffered across the grid).
                pl.BlockSpec((IN_F, tb), lambda i: (0, i)),
                # Weights / biases: constant index_map -> stay VMEM-resident.
                pl.BlockSpec((HIDDEN, IN_F), lambda i: (0, 0)),
                pl.BlockSpec((HIDDEN, 1), lambda i: (0, 0)),
                pl.BlockSpec((OUT_F, HIDDEN), lambda i: (0, 0)),
                pl.BlockSpec((OUT_F, 1), lambda i: (0, 0)),
            ],
            out_specs=pl.BlockSpec((OUT_F, tb), lambda i: (0, i)),
        ),
        compiler_params=pltpu.CompilerParams(
            dimension_semantics=("parallel",),     # megacore sharding on v7x
            vmem_limit_bytes=vmem_limit,
        ),
    )(y_t, w1, b1, w2, b2)


def odefunc_forward_t(y_t, params, *, act_dtype=jnp.float32,
                      block_cap=None, vmem_limit=None):
    """Forward on a transposed, lane-padded state of shape (3, B_pad).

    Use this directly inside an integration loop that keeps the ODE state in
    (3, B_pad) layout: no per-eval transpose/pad/slice dispatches.
    """
    _, b_pad = y_t.shape
    cap, default_limit = _chip_defaults()
    cap = block_cap or cap
    vmem_limit = vmem_limit if vmem_limit is not None else default_limit
    tb = _pick_tile(b_pad, cap)
    return _run_forward_t(y_t, params, tb, act_dtype, vmem_limit)


def odefunc_forward(t, y, params, *, act_dtype=jnp.float32,
                    block_cap=None, vmem_limit=None):
    """Pallas equivalent of ODEFunc.forward(t, y). `t` is unused (as in torch)."""
    del t
    B = y.shape[0]
    cap, default_limit = _chip_defaults()
    cap = block_cap or cap
    vmem_limit = vmem_limit if vmem_limit is not None else default_limit
    tb, b_pad = _choose_tiling(B, cap)
    # Wrapper-side layout plumbing (once per call): transpose + lane pad.
    y_t = jnp.pad(y.astype(jnp.float32).T, ((0, 0), (0, b_pad - B)))
    out_t = _run_forward_t(y_t, params, tb, act_dtype, vmem_limit)
    return out_t[:, :B].T


# --------------------------------------------------------------------------
# Fused explicit-Euler integration: N RHS evaluations in ONE pallas_call.
# --------------------------------------------------------------------------
def _euler_fused_kernel(yt_ref, w1_ref, b1_ref, w2_ref, b2_ref, ot_ref, *,
                        num_steps, dt, act_dtype):
    w1 = w1_ref[...]
    b1 = b1_ref[...]
    w2 = w2_ref[...]
    b2 = b2_ref[...]

    def rhs(y):
        h = jnp.dot(w1, y, preferred_element_type=jnp.float32) + b1
        h = jnp.tanh(h.astype(act_dtype)).astype(jnp.float32)
        return jnp.dot(w2, h, preferred_element_type=jnp.float32) + b2

    def body(_, y):
        return y + dt * rhs(y)

    y = lax.fori_loop(0, num_steps, body, yt_ref[...])
    ot_ref[...] = y.astype(ot_ref.dtype)


def odefunc_euler_fused(y0, params, *, dt, num_steps, act_dtype=jnp.float32,
                        block_cap=None, vmem_limit=None):
    """y_{k+1} = y_k + dt * ODEFunc(y_k), k = 0..num_steps-1, fused in-kernel.

    State stays in VMEM across all steps; weights stay resident; only y0 is
    read from HBM and y_N written back.
    """
    w1, b1, w2, b2 = params
    B = y0.shape[0]
    cap, default_limit = _chip_defaults()
    cap = block_cap or cap
    vmem_limit = vmem_limit if vmem_limit is not None else default_limit
    tb, b_pad = _choose_tiling(B, cap)
    y_t = jnp.pad(y0.astype(jnp.float32).T, ((0, 0), (0, b_pad - B)))

    out_t = pl.pallas_call(
        functools.partial(_euler_fused_kernel, num_steps=num_steps,
                          dt=float(dt), act_dtype=act_dtype),
        out_shape=jax.ShapeDtypeStruct((OUT_F, b_pad), jnp.float32),
        grid_spec=pltpu.PrefetchScalarGridSpec(
            num_scalar_prefetch=0,
            grid=(b_pad // tb,),
            in_specs=[
                pl.BlockSpec((IN_F, tb), lambda i: (0, i)),
                pl.BlockSpec((HIDDEN, IN_F), lambda i: (0, 0)),
                pl.BlockSpec((HIDDEN, 1), lambda i: (0, 0)),
                pl.BlockSpec((OUT_F, HIDDEN), lambda i: (0, 0)),
                pl.BlockSpec((OUT_F, 1), lambda i: (0, 0)),
            ],
            out_specs=pl.BlockSpec((OUT_F, tb), lambda i: (0, i)),
        ),
        compiler_params=pltpu.CompilerParams(
            dimension_semantics=("parallel",),
            vmem_limit_bytes=vmem_limit,
        ),
    )(y_t, w1, b1, w2, b2)
    return out_t[:, :B].T


# --------------------------------------------------------------------------
# Parameter init (matches torch: N(0, 0.1) weights, zero biases) + reference.
# --------------------------------------------------------------------------
def init_params(key):
    k1, k2 = jax.random.split(key)
    w1 = 0.1 * jax.random.normal(k1, (HIDDEN, IN_F), dtype=jnp.float32)   # Linear(3,50).weight
    w2 = 0.1 * jax.random.normal(k2, (OUT_F, HIDDEN), dtype=jnp.float32)  # Linear(50,3).weight
    b1 = jnp.zeros((HIDDEN, 1), dtype=jnp.float32)
    b2 = jnp.zeros((OUT_F, 1), dtype=jnp.float32)
    return (w1, b1, w2, b2)


def reference_forward(t, y, params):
    del t
    w1, b1, w2, b2 = params
    h = jnp.tanh(y @ w1.T + b1.T)   # (B, 50)
    return h @ w2.T + b2.T          # (B, 3)


if __name__ == "__main__":
    key = jax.random.PRNGKey(0)
    kp, ky1, ky2 = jax.random.split(key, 3)
    params = init_params(kp)
    t = jnp.float32(0.0)  # ignored, kept for API parity with ODEFunc.forward

    # Tolerances: both kernel and XLA reference matmuls may use the TPU's
    # default (bf16-input) f32 dot precision -> allow ~1e-3-level deltas.
    atol, rtol = 5e-3, 1e-2

    # 1) Single forward pass at the intended ODE-use batch size (B = 8).
    y_small = jax.random.normal(ky1, (8, IN_F), dtype=jnp.float32)
    out_small = jax.block_until_ready(odefunc_forward(t, y_small, params))
    ref_small = reference_forward(t, y_small, params)
    assert out_small.shape == (8, OUT_F)
    assert jnp.allclose(out_small, ref_small, atol=atol, rtol=rtol), "fwd(B=8) mismatch"

    # 2) Multi-tile forward (exercises grid > 1 / megacore-parallel path).
    y_big = jax.random.normal(ky2, (384, IN_F), dtype=jnp.float32)
    out_big = jax.block_until_ready(odefunc_forward(t, y_big, params))
    ref_big = reference_forward(t, y_big, params)
    assert out_big.shape == (384, OUT_F)
    assert jnp.allclose(out_big, ref_big, atol=atol, rtol=rtol), "fwd(B=384) mismatch"

    # 3) Fused explicit-Euler integration: 16 RHS evals in a single pallas_call.
    num_steps, dt = 16, 0.05
    out_euler = jax.block_until_ready(
        odefunc_euler_fused(y_small, params, dt=dt, num_steps=num_steps))
    y_ref = y_small
    for _ in range(num_steps):
        y_ref = y_ref + dt * reference_forward(t, y_ref, params)
    assert out_euler.shape == (8, IN_F)
    assert jnp.allclose(out_euler, y_ref, atol=1e-2, rtol=1e-2), "fused Euler mismatch"

    print("KERNEL_OK")
</pallas_src>

<mosaic_0001>
module attributes {stable_mosaic.version = 11 : i64} {
  func.func @_odefunc_kernel(%arg0: i32, %arg1: memref<3x128xf32, #tpu.memory_space<vmem>>, %arg2: memref<50x3xf32, #tpu.memory_space<vmem>>, %arg3: memref<50x1xf32, #tpu.memory_space<vmem>>, %arg4: memref<3x50xf32, #tpu.memory_space<vmem>>, %arg5: memref<3x1xf32, #tpu.memory_space<vmem>>, %arg6: memref<3x128xf32, #tpu.memory_space<vmem>>) attributes {dimension_semantics = [#tpu.dimension_semantics<parallel>], iteration_bounds = array<i64: 1>, scalar_prefetch = 0 : i64, scratch_operands = 0 : i64, tpu.core_type = #tpu.core_type<tc>, window_params = [{transform_indices = @transform_0, window_bounds = array<i64: 3, 128>}, {pipeline_mode = #tpu.pipeline_mode<synchronous>, transform_indices = @transform_1, window_bounds = array<i64: 50, 3>}, {pipeline_mode = #tpu.pipeline_mode<synchronous>, transform_indices = @transform_2, window_bounds = array<i64: 50, 1>}, {pipeline_mode = #tpu.pipeline_mode<synchronous>, transform_indices = @transform_3, window_bounds = array<i64: 3, 50>}, {pipeline_mode = #tpu.pipeline_mode<synchronous>, transform_indices = @transform_4, window_bounds = array<i64: 3, 1>}, {transform_indices = @transform_5, window_bounds = array<i64: 3, 128>}]} {
    %c0 = arith.constant 0 : index
    %c0_0 = arith.constant 0 : index
    %0 = vector.load %arg1[%c0, %c0_0] : memref<3x128xf32, #tpu.memory_space<vmem>>, vector<3x128xf32>
    %c0_1 = arith.constant 0 : index
    %c0_2 = arith.constant 0 : index
    %1 = vector.load %arg2[%c0_1, %c0_2] : memref<50x3xf32, #tpu.memory_space<vmem>>, vector<50x3xf32>
    %cst = arith.constant dense<0.000000e+00> : vector<50x128xf32>
    %2 = tpu.matmul %1, %0, %cst {dimension_numbers = #tpu.dot_dimension_numbers<[1], [0], [0], [1], [0, 0, 1, 1], [], []>} : vector<50x3xf32>, vector<3x128xf32>, vector<50x128xf32> -> vector<50x128xf32>
    %c0_3 = arith.constant 0 : index
    %c0_4 = arith.constant 0 : index
    %3 = vector.load %arg3[%c0_3, %c0_4] : memref<50x1xf32, #tpu.memory_space<vmem>>, vector<50x1xf32>
    %4 = vector.broadcast %3 : vector<50x1xf32> to vector<50x128xf32>
    %5 = arith.addf %2, %4 : vector<50x128xf32>
    %6 = math.tanh %5 : vector<50x128xf32>
    %c0_5 = arith.constant 0 : index
    %c0_6 = arith.constant 0 : index
    %7 = vector.load %arg4[%c0_5, %c0_6] : memref<3x50xf32, #tpu.memory_space<vmem>>, vector<3x50xf32>
    %cst_7 = arith.constant dense<0.000000e+00> : vector<3x128xf32>
    %8 = tpu.matmul %7, %6, %cst_7 {dimension_numbers = #tpu.dot_dimension_numbers<[1], [0], [0], [1], [0, 0, 1, 1], [], []>} : vector<3x50xf32>, vector<50x128xf32>, vector<3x128xf32> -> vector<3x128xf32>
    %c0_8 = arith.constant 0 : index
    %c0_9 = arith.constant 0 : index
    %9 = vector.load %arg5[%c0_8, %c0_9] : memref<3x1xf32, #tpu.memory_space<vmem>>, vector<3x1xf32>
    %10 = vector.broadcast %9 : vector<3x1xf32> to vector<3x128xf32>
    %11 = arith.addf %8, %10 : vector<3x128xf32>
    %c0_10 = arith.constant 0 : index
    %c0_11 = arith.constant 0 : index
    %12 = vector.load %arg6[%c0_10, %c0_11] : memref<3x128xf32, #tpu.memory_space<vmem>>, vector<3x128xf32>
    tpu.vector_store %arg6[%c0_10, %c0_11], %11 {strides = array<i32>} : memref<3x128xf32, #tpu.memory_space<vmem>>, vector<3x128xf32>,
    return
  }
  func.func @transform_0(%arg0: i32) -> (i32, i32) {
    %c0_i32 = arith.constant 0 : i32
    %c0_i32_0 = arith.constant 0 : i32
    return %c0_i32, %arg0 : i32, i32
  }
  func.func @transform_1(%arg0: i32) -> (i32, i32) {
    %c0_i32 = arith.constant 0 : i32
    %c0_i32_0 = arith.constant 0 : i32
    %c0_i32_1 = arith.constant 0 : i32
    return %c0_i32, %c0_i32_0 : i32, i32
  }
  func.func @transform_2(%arg0: i32) -> (i32, i32) {
    %c0_i32 = arith.constant 0 : i32
    %c0_i32_0 = arith.constant 0 : i32
    %c0_i32_1 = arith.constant 0 : i32
    return %c0_i32, %c0_i32_0 : i32, i32
  }
  func.func @transform_3(%arg0: i32) -> (i32, i32) {
    %c0_i32 = arith.constant 0 : i32
    %c0_i32_0 = arith.constant 0 : i32
    %c0_i32_1 = arith.constant 0 : i32
    return %c0_i32, %c0_i32_0 : i32, i32
  }
  func.func @transform_4(%arg0: i32) -> (i32, i32) {
    %c0_i32 = arith.constant 0 : i32
    %c0_i32_0 = arith.constant 0 : i32
    %c0_i32_1 = arith.constant 0 : i32
    return %c0_i32, %c0_i32_0 : i32, i32
  }
  func.func @transform_5(%arg0: i32) -> (i32, i32) {
    %c0_i32 = arith.constant 0 : i32
    %c0_i32_0 = arith.constant 0 : i32
    return %c0_i32, %arg0 : i32, i32
  }
}

</mosaic_0001>

<bundles_post_ra>
// kernel: tpu_custom_call.1
= control target key start
LH: loop header
LB: loop body
LE: loop exit
PB: predicated region body
PF: predicated region fallthrough
CT: control target
= control target key end

     0   :  { %vm93_vm0 = vcmask 1042432   ;;  %v424_v2 = vmov 0.0   ;;  %vm425_vm1 = vmmov 0   ;;  %vm71_vm2 = vcmask 23552   ;;  %s547_s0 = inlined_call_operand.vmem [shape: f32[3,128], index: 0, kind: input, shape index: {}]   ;;  %s548_s1 = inlined_call_operand.vmem [shape: f32[50,3], index: 1, kind: input, shape index: {}]   ;;  %s549_s2 = inlined_call_operand.vmem [shape: f32[50,1], index: 2, kind: input, shape index: {}]   ;;  %s550_s3 = inlined_call_operand.vmem [shape: f32[3,50], index: 3, kind: input, shape index: {}]   ;;  %s551_s4 = inlined_call_operand.vmem [shape: f32[3,1], index: 4, kind: input, shape index: {}]   ;;  %s552_s5 = inlined_call_operand.hbm [shape: f32[3,128], index: 5, kind: output, shape index: {}]  }
   0x1   :  { %v21_v0 = vld [vmem:[%s547_s0] sm:$0x7]  ;;  %330 = vmatprep.subr.mxu0 %v424_v2  ;;  %332 = vmatprep.mubr.msk.f32.mxu0 %vm425_vm1, %v424_v2  ;;  %v426_v3 = vmov 0   ;;  %v31_v5 = vld [vmem:[%s549_s2 + $0x10] sm:$0xff]  ;;  %v23_v6 = vld [vmem:[%s548_s1 + $0x8] sm:$0xff] }
   0x2   :  { %v22_v1 = vld [vmem:[%s548_s1] sm:$0xff]  ;;  %331 = vmatpush3.msk.msra.mxu0 %vm93_vm0, %v21_v0  ;;  %384 = vset.pattern.permute.xlu0 %v426_v3  ;;  %v30_v7 = vld [vmem:[%s549_s2 + $0x8] sm:$0xff] }
   0x3   :  { %333 = vmatmul.mubr.msk.f32.vlgmr.msra.gmra.mrb[0].mxu0 %vm71_vm2, %v22_v1  ;;  %v29_v4 = vld [vmem:[%s549_s2] sm:$0xff]  ;;  %385 = vset.pattern.permute.xlu1 %v426_v3 }
   0x4   :  { %335 = vmatprep.mubr.msk.f32.mxu0 %vm425_vm1, %v424_v2  ;;  %38 = vperm.xlu0 %384, %v29_v4  }
   0x5   :  { %48 = vperm.xlu1 %385, %v31_v5   ;;  %367 = vmatprep.mubr.msk.f32.mxu1 %vm425_vm1, %v424_v2 }
   0x6   :  { %10 = vsyncpa [#allocation3], 0  ;;  %v32_v8 = vld [vmem:[%s549_s2 + $0x18] sm:$0xff]  ;;  %v24_v9 = vld [vmem:[%s548_s1 + $0x10] sm:$0xff]  ;;  %v427_v18 = vmov 0.0|0.0   ;;  %vm215_vm3 = vcmask 1041408  }
   0x7   :  { %336 = vmatmul.mubr.msk.f32.gmra.mrb[2].mxu0 %vm71_vm2, %v23_v6  ;;  %v33_v10 = vld [vmem:[%s549_s2 + $0x20] sm:$0xff]  ;;  %v34_v11 = vld [vmem:[%s549_s2 + $0x28] sm:$0xff]  ;;  %v25_v12 = vld [vmem:[%s548_s1 + $0x18] sm:$0xff]  ;;  %370 = vmatprep.subr.bf16.mxu1 %v427_v18  ;;  %vm211_vm4 = vcmask 408576   ;;  %s428_s0 = smov [#allocation2]  }
   0x8   :  { %338 = vmatprep.mubr.msk.f32.mxu0 %vm425_vm1, %v424_v2  ;;  %43 = vperm.xlu0 %384, %v30_v7   ;;  %v35_v13 = vld [vmem:[%s549_s2 + $0x30] sm:$0x3]  ;;  %v205_v14 = vld [vmem:[%s551_s4] sm:$0x7]  ;;  %v27_v16 = vld [vmem:[%s548_s1 + $0x28] sm:$0xff]  ;;  %s296_s23 = sshll.u32 %s428_s0, 4  ;;  %s297_s23 = int_to_ptr.vmem [resolvable:$true] %s296_s23 }
   0x9   :  { %53 = vperm.xlu1 %385, %v32_v8   ;;  %v26_v15 = vld [vmem:[%s548_s1 + $0x20] sm:$0xff]  ;;  %v28_v17 = vld [vmem:[%s548_s1 + $0x30] sm:$0x3]  ;;  %s400_s24 = scalar_lea.vmem %s297_s23, 64  ;;  %p405_p1 = scmp.lt.s32.totalorder %s297_s23, %s297_s23 }
   0xa   :  { %v204_v56 = vld [vmem:[%s550_s3] sm:$0x7]  ;;  %p401_p0 = scmp.ne.s32.totalorder %s297_s23, %s400_s24  ;;  %p406_p2 = scmp.lt.s32.totalorder %s400_s24, %s400_s24 }
   0xb   :  { %339 = vmatmul.mubr.msk.f32.gmra.mrb[4].mxu0 %vm71_vm2, %v24_v9 }
   0xc   :  { %341 = vmatprep.mubr.msk.f32.mxu0 %vm425_vm1, %v424_v2  ;;  %58 = vperm.xlu0 %384, %v33_v10   ;;  %p407_p3 = por %p406_p2, %p405_p1 }
   0xd   :  { %63 = vperm.xlu1 %385, %v34_v11  }
   0xe   :  { %p408_p4 = pnand %p407_p3, %p401_p0 }
   0xf   :  { %342 = vmatmul.mubr.msk.f32.gmra.mrb[6].mxu0 %vm71_vm2, %v25_v12 }
  0x10   :  { %344 = vmatprep.mubr.msk.f32.mxu0 %vm425_vm1, %v424_v2  ;;  %68 = vperm.xlu0 %384, %v35_v13  }
  0x11   :  { %208 = vperm.xlu1 %385, %v205_v14  }
  0x13   :  { %345 = vmatmul.mubr.msk.f32.gmra.mrb[8].mxu0 %vm71_vm2, %v26_v15 }
  0x14   :  { %347 = vmatprep.mubr.msk.f32.mxu0 %vm425_vm1, %v424_v2 }
  0x17   :  { %348 = vmatmul.mubr.msk.f32.gmra.mrb[10].mxu0 %vm71_vm2, %v27_v16 }
  0x18   :  { %350 = vmatprep.mubr.msk.f32.mxu0 %vm425_vm1, %v424_v2 }
  0x1b   :  { %351 = vmatmul.mubr.msk.f32.gmra.mrb[12].mxu0 %vm71_vm2, %v28_v17 }
  0x83   :  { %v39_v19 = vpop.permute.xlu0 %38 }
  0x84   :  { %v49_v27 = vpop.permute.xlu1 %48 }
  0x87   :  { %v44_v23 = vpop.permute.xlu0 %43 }
  0x88   :  { %v54_v31 = vpop.permute.xlu1 %53 }
  0x8b   :  { %v59_v38 = vpop.permute.xlu0 %58 }
  0x8c   :  { %v64_v42 = vpop.permute.xlu1 %63 }
  0x8f   :  { %v69_v47 = vpop.permute.xlu0 %68 }
  0x90   :  { %v209_v58 = vpop.permute.xlu1 %208 }
  0xd6   :  { %v163_v20 = vpop.f32.mrb[0].mxu0 }
  0xd7   :  { %v334_v21 = vpop.f32.mrb[1].mxu0  ;;  %v164_v22 = vadd.f32 %v163_v20, %v39_v19 }
  0xd9   :  { %386 = vtanh.f32 %v164_v22 }
  0xda   :  { %v168_v24 = vpop.f32.mrb[2].mxu0 }
  0xdb   :  { %v169_v25 = vadd.f32 %v168_v24, %v44_v23  ;;  %v337_v26 = vpop.f32.mrb[3].mxu0 }
  0xdd   :  { %388 = vtanh.f32 %v169_v25 }
  0xde   :  { %v173_v28 = vpop.f32.mrb[4].mxu0 }
  0xdf   :  { %v340_v29 = vpop.f32.mrb[5].mxu0  ;;  %v174_v30 = vadd.f32 %v173_v28, %v49_v27 }
  0xe1   :  { %390 = vtanh.f32 %v174_v30 }
  0xe2   :  { %v178_v32 = vpop.f32.mrb[6].mxu0 }
  0xe3   :  { %v179_v33 = vadd.f32 %v178_v32, %v54_v31  ;;  %v343_v34 = vpop.f32.mrb[7].mxu0  ;;  %v387_v35 = vpop.eup %386 }
  0xe5   :  { %392 = vtanh.f32 %v179_v33 }
  0xe6   :  { %v183_v36 = vpop.f32.mrb[8].mxu0 }
  0xe7   :  { %v389_v37 = vpop.eup %388  ;;  %v346_v39 = vpop.f32.mrb[9].mxu0  ;;  %v184_v40 = vadd.f32 %v183_v36, %v59_v38 }
  0xe8   :  { %v371_v41 = vpack.c.bf16 %v389_v37, %v387_v35 }
  0xe9   :  { %394 = vtanh.f32 %v184_v40 }
  0xea   :  { %v188_v43 = vpop.f32.mrb[10].mxu0  ;;  %372 = vmatpush3.bf16.msra.mxu1 %v371_v41 }
  0xeb   :  { %v189_v44 = vadd.f32 %v188_v43, %v64_v42  ;;  %v349_v45 = vpop.f32.mrb[11].mxu0  ;;  %373 = vmatprep.subr.bf16.mxu1 %v427_v18  ;;  %v391_v46 = vpop.eup %390 }
  0xed   :  { %396 = vtanh.f32 %v189_v44 }
  0xee   :  { %v193_v48 = vpop.f32.mrb[12].mxu0 }
  0xef   :  { %v393_v49 = vpop.eup %392  ;;  %v194_v50 = vadd.f32 %v193_v48, %v69_v47  ;;  %v352_v51 = vpop.f32.mrb[13].mxu0 }
  0xf0   :  { %v374_v52 = vpack.c.bf16 %v393_v49, %v391_v46 }
  0xf1   :  { %398 = vtanh.f32 %v194_v50 }
  0xf2   :  { %375 = vmatpush3.bf16.msra.mxu1 %v374_v52 }
  0xf3   :  { %376 = vmatprep.subr.bf16.mxu1 %v427_v18  ;;  %v395_v53 = vpop.eup %394 }
  0xf7   :  { %v397_v54 = vpop.eup %396 }
  0xf8   :  { %v377_v55 = vpack.c.bf16 %v397_v54, %v395_v53 }
  0xfa   :  { %378 = vmatpush3.bf16.msra.mxu1 %v377_v55 }
  0xfb   :  { %365 = vmatprep.subr.mxu1 %v424_v2  ;;  %v399_v57 = vpop.eup %398 }
  0xfe   :  { %366 = vmatpush3.msk.msra.mxu1 %vm215_vm3, %v399_v57 }
  0xff   :  { %368 = vmatmul.mubr.msk.f32.vlgmr.msra.gmra.mrb[0].mxu1 %vm211_vm4, %v204_v56 }
 0x1d2   :  { %v285_v59 = vpop.f32.mrb[0].mxu1 }
 0x1d3   :  { %v286_v60 = vadd.f32 %v285_v59, %v209_v58  ;;  %v369_v61 = vpop.f32.mrb[1].mxu1 }
 0x1d5   :  { %289 = vst [vmem:[#allocation2] sm:$0x7] %v286_v60 }
 0x1d6   :  { %411 = shalt.err (!%p408_p4)
}
 0x1d7   :  { %s412_s26 = scalar_lea.hbm %s552_s5, 64 }
 0x1d8   :  { %p413_p5 = scmp.ne.s32.totalorder %s552_s5, %s412_s26  ;;  %p416_p6 = scmp.lt.u32.totalorder %s412_s26, %s552_s5 }
 0x1da   :  { %p418_p7 = pnand %p416_p6, %p413_p5 }
 0x1dc   :  { %421 = shalt.err (!%p418_p7)
}
 0x1dd   :  { %299 = dma.vmem_to_hbm [thread:$0]  %s297_s23, 64, %s552_s5, [#allocation3]  }
 0x1de   :  { %422 = dma.done.wait [#allocation3], 64  }
 0x1df   :  { %423 = vsyncadd [#allocation3], 4294967232 }
 0x1e0   :  { %303 = vsyncpa [#allocation3], 1 }

</bundles_post_ra>
